<compile_context>
chip_gen: v6e
topology: v6e:2x2x1
jax: 0.10.0
libtpu: 0.0.40
codegen_flags: <defaults>
</compile_context>

<pallas_src>
import jax
import jax.numpy as jnp
from jax.experimental import pallas as pl
from jax.experimental.pallas import tpu as pltpu


def _cat_kernel(x_ref, b_ref, o_ref):
    # x_ref: (1, C1, Ft), b_ref: (1, C2, Ft), o_ref: (1, C1+C2, Ft)
    c1 = x_ref.shape[1]
    o_ref[:, :c1, :] = x_ref[...]
    o_ref[:, c1:, :] = b_ref[...]


def _choose_feature_tile(f, c_total, dtype_bytes, budget_bytes=8 * 1024 * 1024):
    """Pick a lane tile Ft that divides F, is a multiple of 128 (or is F
    itself), and keeps the double-buffered per-step VMEM footprint well under
    budget_bytes.

    Per-step VMEM with double buffering:
        2 * (C1*Ft + C2*Ft + (C1+C2)*Ft) * dsize = 4 * c_total * Ft * dsize
    """
    if f % 128 != 0:
        # Full-extent last dim is always a legal block shape.
        return f
    per_lane = 4 * c_total * dtype_bytes
    ft = f
    while (ft > 128 and ft * per_lane > budget_bytes
           and ft % 2 == 0 and (ft // 2) % 128 == 0):
        ft //= 2
    return ft


def cat_channels(x, bridge):
    """torch.cat((x, bridge), dim=1) for NCHW tensors, as a Pallas TPU kernel."""
    assert x.shape[0] == bridge.shape[0], "batch dims must match"
    assert x.shape[2:] == bridge.shape[2:], "spatial dims must match"
    assert x.dtype == bridge.dtype, "dtypes must match"
    n, c1, h, w = x.shape
    c2 = bridge.shape[1]
    c_total = c1 + c2
    f = h * w
    dsize = jnp.dtype(x.dtype).itemsize

    # Lane-dense layout: last dim becomes H*W instead of W.
    x3 = x.reshape(n, c1, f)
    b3 = bridge.reshape(n, c2, f)

    ft = _choose_feature_tile(f, c_total, dsize)
    n_ft = f // ft if f % ft == 0 else pl.cdiv(f, ft)

    out_bytes = n * c_total * f * dsize

    out3 = pl.pallas_call(
        _cat_kernel,
        out_shape=jax.ShapeDtypeStruct((n, c_total, f), x.dtype),
        grid_spec=pltpu.PrefetchScalarGridSpec(
            num_scalar_prefetch=0,
            grid=(n, n_ft),
            in_specs=[
                pl.BlockSpec((1, c1, ft), lambda i, j: (i, 0, j)),
                pl.BlockSpec((1, c2, ft), lambda i, j: (i, 0, j)),
            ],
            out_specs=pl.BlockSpec((1, c_total, ft), lambda i, j: (i, 0, j)),
        ),
        compiler_params=pltpu.CompilerParams(
            dimension_semantics=("parallel", "parallel"),
            vmem_limit_bytes=48 * 1024 * 1024,
        ),
        cost_estimate=pl.CostEstimate(
            flops=0,
            transcendentals=0,
            bytes_accessed=2 * out_bytes,  # read x + bridge, write out
        ),
    )(x3, b3)

    return out3.reshape(n, c_total, h, w)


if __name__ == "__main__":
    key = jax.random.PRNGKey(0)
    kx, kb = jax.random.split(key)

    # Small shapes consistent with the module's forward (NCHW).
    x = jax.random.normal(kx, (2, 4, 16, 16), dtype=jnp.float32)
    bridge = jax.random.normal(kb, (2, 4, 16, 16), dtype=jnp.float32)

    out = cat_channels(x, bridge)
    out = jax.block_until_ready(out)

    # Verify against plain-JAX reference (same semantics as torch.cat(dim=1)).
    ref = jnp.concatenate((x, bridge), axis=1)
    assert out.shape == ref.shape
    assert out.dtype == ref.dtype
    assert bool(jnp.array_equal(out, ref))

    print("KERNEL_OK")
</pallas_src>

<mosaic_0001>
module attributes {stable_mosaic.version = 11 : i64} {
  func.func @_cat_kernel(%arg0: i32, %arg1: i32, %arg2: memref<1x4x256xf32, #tpu.memory_space<vmem>>, %arg3: memref<1x4x256xf32, #tpu.memory_space<vmem>>, %arg4: memref<1x8x256xf32, #tpu.memory_space<vmem>>) attributes {dimension_semantics = [#tpu.dimension_semantics<parallel>, #tpu.dimension_semantics<parallel>], iteration_bounds = array<i64: 2, 1>, scalar_prefetch = 0 : i64, scratch_operands = 0 : i64, tpu.core_type = #tpu.core_type<tc>, window_params = [{transform_indices = @transform_0, window_bounds = array<i64: 1, 4, 256>}, {transform_indices = @transform_1, window_bounds = array<i64: 1, 4, 256>}, {transform_indices = @transform_2, window_bounds = array<i64: 1, 8, 256>}]} {
    %c0 = arith.constant 0 : index
    %c0_0 = arith.constant 0 : index
    %c0_1 = arith.constant 0 : index
    %0 = vector.load %arg2[%c0, %c0_0, %c0_1] : memref<1x4x256xf32, #tpu.memory_space<vmem>>, vector<1x4x256xf32>
    %c0_2 = arith.constant 0 : index
    %c0_3 = arith.constant 0 : index
    %c0_4 = arith.constant 0 : index
    %1 = vector.load %arg4[%c0_2, %c0_3, %c0_4] : memref<1x8x256xf32, #tpu.memory_space<vmem>>, vector<1x4x256xf32>
    tpu.vector_store %arg4[%c0_2, %c0_3, %c0_4], %0 {strides = array<i32>} : memref<1x8x256xf32, #tpu.memory_space<vmem>>, vector<1x4x256xf32>,
    %c0_5 = arith.constant 0 : index
    %c0_6 = arith.constant 0 : index
    %c0_7 = arith.constant 0 : index
    %2 = vector.load %arg3[%c0_5, %c0_6, %c0_7] : memref<1x4x256xf32, #tpu.memory_space<vmem>>, vector<1x4x256xf32>
    %c0_8 = arith.constant 0 : index
    %c4 = arith.constant 4 : index
    %c0_9 = arith.constant 0 : index
    %3 = vector.load %arg4[%c0_8, %c4, %c0_9] : memref<1x8x256xf32, #tpu.memory_space<vmem>>, vector<1x4x256xf32>
    tpu.vector_store %arg4[%c0_8, %c4, %c0_9], %2 {strides = array<i32>} : memref<1x8x256xf32, #tpu.memory_space<vmem>>, vector<1x4x256xf32>,
    return
  }
  func.func @transform_0(%arg0: i32, %arg1: i32) -> (i32, i32, i32) {
    %c0_i32 = arith.constant 0 : i32
    %c0_i32_0 = arith.constant 0 : i32
    return %arg0, %c0_i32, %arg1 : i32, i32, i32
  }
  func.func @transform_1(%arg0: i32, %arg1: i32) -> (i32, i32, i32) {
    %c0_i32 = arith.constant 0 : i32
    %c0_i32_0 = arith.constant 0 : i32
    return %arg0, %c0_i32, %arg1 : i32, i32, i32
  }
  func.func @transform_2(%arg0: i32, %arg1: i32) -> (i32, i32, i32) {
    %c0_i32 = arith.constant 0 : i32
    %c0_i32_0 = arith.constant 0 : i32
    return %arg0, %c0_i32, %arg1 : i32, i32, i32
  }
}

</mosaic_0001>

<bundles_post_ra>
// kernel: tpu_custom_call.1
= control target key start
LH: loop header
LB: loop body
LE: loop exit
PB: predicated region body
PF: predicated region fallthrough
CT: control target
= control target key end

     0   :  { %7 = vsyncpa [#allocation3], 0  ;;  %s781_s0 = inlined_call_operand.hbm [shape: f32[2,4,256], index: 0, kind: input, shape index: {}]   ;;  %s782_s1 = inlined_call_operand.hbm [shape: f32[2,4,256], index: 1, kind: input, shape index: {}]   ;;  %s783_s2 = inlined_call_operand.hbm [shape: f32[2,8,256], index: 2, kind: output, shape index: {}]  }
   0x1   :  { %9 = vsyncpa [#allocation3 + $0x1], 0 }
   0x2   :  { %10 = vsyncpa [#allocation6], 0 }
   0x3   :  { %12 = vsyncpa [#allocation6 + $0x1], 0 }
   0x4   :  { %13 = vsyncpa [#allocation4], 0 }
   0x5   :  { %15 = vsyncpa [#allocation4 + $0x1], 0  ;;  %s613_s9 = smov 0   ;;  %s615_s10 = smov 0  }
   0x6   :  { %s617_s11 = smov 0   ;;  %s619_s12 = smov 0  }
   0x7   :  { %s621_s13 = smov 0   ;;  %s623_s14 = smov 0  }
   0x8 LB: > { %s362_s15 = sadd.s32 4294967295, %s593_s14   ;;  %s363_s16 = sadd.s32 4294967294, %s593_s14   ;;  %s593_s14 = sphi %s623_s14, %s21_s14   ;;  %s589_s13 = sphi %s621_s13, %s795_s13   ;;  %s585_s12 = sphi %s619_s12, %s794_s12   ;;  %s581_s11 = sphi %s617_s11, %s793_s11   ;;  %s577_s10 = sphi %s615_s10, %s792_s10   ;;  %s573_s9 = sphi %s613_s9, %s791_s9  }
   0x9   : > { %s33_s17 = sadd.s32 1, %s589_s13  ;;  %s42_s18 = sadd.s32 1, %s581_s11 }
   0xa   : > { %p35_p0 = scmp.ge.s32.totalorder %s33_s17, 2  ;;  %p49_p1 = scmp.ne.s32.totalorder %s581_s11, %s577_s10 }
   0xb   : > { %p50_p2 = scmp.eq.s32.totalorder %s593_s14, 0  ;;  %p55_p3 = scmp.ne.s32.totalorder %s577_s10, %s573_s9 }
   0xc   : > { %s797_s17 = smov (%p35_p0, %s33_s17), 0  ;;  %p56_p5 = scmp.eq.s32.totalorder %s362_s15, 0 }
   0xd   : > { %p654_p4 = por %p50_p2, %p49_p1  ;;  %s37_s20 = ssub.s32 %s589_s13, %s797_s17 }
   0xe   : > { %p109_p6 = scmp.eq.s32.totalorder %s362_s15, 1  ;;  %p40_p7 = scmp.eq.s32.totalorder %s37_s20, 0 }
   0xf   : > { %p660_p8 = por %p56_p5, %p55_p3  ;;  %p115_p10 = scmp.eq.s32.totalorder %s363_s16, 1 }
  0x10   : > { %p664_p9 = por %p109_p6, %p49_p1  ;;  %p401_p13 = scmp.lt.s32.totalorder %s593_s14, 2 }
  0x11   : > { %s669_s23 = scalar_select %p40_p7, %s581_s11, %s42_s18  }
  0x12   : > { %p671_p11 = por %p115_p10, %p55_p3  ;;  %s678_s25 = sand.u32 1, %s581_s11  }
  0x13   : > { %s366_s26 = sshll.u32 %s678_s25, 3  ;;  %s381_s27 = sshll.u32 %s589_s13, 7 }
  0x14   : > { %s147_s30 = scalar_lea.hbm %s781_s0, %s381_s27  ;;  %s139_s3 = scalar_lea.vmem [#allocation2], %s366_s26 }
  0x15   : > { %s149_s4 = sshll.u32 %s139_s3, 4  ;;  %p687_p0 = pnand %p401_p13, %p654_p4  ;;  %s150_s4 = int_to_ptr.vmem [resolvable:$true] %s149_s4 }
  0x16   : > { %p372_p1 = scmp.ge.s32.totalorder %s593_s14, 1  ;;  %p175_p2 = scmp.lt.s32.totalorder %s593_s14, 3 }
  0x17   : > { %s136_s6 = scalar_lea.sflag [#allocation3], %s678_s25  ;;  %p455_p3 = pneg %p687_p0 }
  0x18   : > { %s466_s7 = scalar_lea.vmem %s150_s4, 128  ;;  %s595_s8 = smov [#allocation2]  }
  0x19   : > { %p467_p5 = scmp.ne.s32.totalorder %s150_s4, %s466_s7  ;;  %s471_s15 = sshll.u32 %s595_s8, 4  ;;  %s472_s15 = int_to_ptr.vmem [resolvable:$false] %s471_s15 }
  0x1a   : > { %s473_s16 = scalar_lea.vmem %s472_s15, 256  ;;  %p474_p4 = scmp.lt.s32.totalorder %s150_s4, %s472_s15 }
  0x1b   : > { %p469_p6 = pnand %p467_p5, %p455_p3  ;;  %p475_p10 = scmp.lt.s32.totalorder %s473_s16, %s466_s7 }
  0x1d   : > { %p470_p7 = pneg %p469_p6  ;;  %p476_p13 = por %p475_p10, %p474_p4 }
  0x1f   : > { %p477_p12 = pnand %p476_p13, %p470_p7 }
  0x21   : > { %480 = shalt.err (!%p477_p12)
}
  0x22   : > { %393 = dma.hbm_to_vmem [thread:$0]  (!%p687_p0), %s147_s30, 128, %s150_s4, %s136_s6  }
  0x23   : > { %p705_p5 = pnand %p372_p1, %p175_p2  ;;  %s168_s28 = scalar_lea.hbm %s782_s1, %s381_s27 }
  0x24   : > { %s160_s29 = scalar_lea.vmem [#allocation5], %s366_s26  ;;  %s157_s7 = scalar_lea.sflag [#allocation6], %s678_s25 }
  0x25   : > { %s170_s3 = sshll.u32 %s160_s29, 4  ;;  %s596_s30 = smov [#allocation5]   ;;  %s171_s3 = int_to_ptr.vmem [resolvable:$true] %s170_s3 }
  0x26   : > { %s494_s8 = scalar_lea.vmem %s171_s3, 128  ;;  %s499_s4 = sshll.u32 %s596_s30, 4  ;;  %s500_s4 = int_to_ptr.vmem [resolvable:$false] %s499_s4 }
  0x27   : > { %p495_p12 = scmp.ne.s32.totalorder %s171_s3, %s494_s8  ;;  %s501_s6 = scalar_lea.vmem %s500_s4, 256 }
  0x28   : > { %p502_p1 = scmp.lt.s32.totalorder %s171_s3, %s500_s4  ;;  %p503_p2 = scmp.lt.s32.totalorder %s501_s6, %s494_s8 }
  0x29   : > { %p497_p6 = pnand %p495_p12, %p455_p3 }
  0x2a   : > { %p504_p4 = por %p503_p2, %p502_p1 }
  0x2b   : > { %p498_p7 = pneg %p497_p6 }
  0x2d   : > { %p505_p10 = pnand %p504_p4, %p498_p7 }
  0x2f   : > { %508 = shalt.err (!%p505_p10)
}
  0x30   : > { %396 = dma.hbm_to_vmem [thread:$0]  (!%p687_p0), %s168_s28, 128, %s171_s3, %s157_s7  }
  0x31   : > { %179 = sbr.rel (%p705_p5) target bundleno = 81 (0x51), region = 28  ;;  %s721_s25 = sand.u32 (!%p705_p5), 1, %s577_s10  }
  0x32   : > { %s373_s26 = sshll.u32 (!%p705_p5), %s721_s25, 3  ;;  %s182_s27 = scalar_lea.sflag (!%p705_p5), [#allocation3], %s721_s25 }
  0x33   : > { %s185_s15 = scalar_lea.vmem (!%p705_p5), [#allocation2], %s373_s26 }
  0x36   : > { %560 = dma.done.wait (%p660_p8), %s182_s27, 128  }
  0x37   : > { %562 = vsyncadd (%p660_p8), %s182_s27, 4294967168  ;;  %s191_s5 = scalar_lea.sflag [#allocation6], %s721_s25  ;;  %s194_s16 = scalar_lea.vmem [#allocation5], %s373_s26 }
  0x38   : > { %564 = dma.done.wait (%p660_p8), %s191_s5, 128  }
  0x39   : > { %566 = vsyncadd (%p660_p8), %s191_s5, 4294967168  ;;  %s375_s18 = sshll.u32 %s721_s25, 4  ;;  %s383_s28 = sshll.u32 %s585_s12, 8  ;;  %v223_v0 = vld [vmem:[%s185_s15] sm:$0xff]  ;;  %v229_v1 = vld [vmem:[%s194_s16] sm:$0xff] }
  0x3a   : > { %s219_s19 = scalar_lea.vmem [#allocation7], %s375_s18  ;;  %v225_v2 = vcombine.high %v223_v0, %v223_v0  ;;  %v231_v3 = vcombine.low %v229_v1, %v229_v1  ;;  %s250_s3 = scalar_lea.hbm %s783_s2, %s383_s28 }
  0x3b   : > { %s252_s20 = sshll.u32 %s219_s19, 4  ;;  %227 = vst [vmem:[%s219_s19] sm:$0xf] %v223_v0  ;;  %234 = vst [vmem:[%s219_s19 + $0x8] sm:$0xf0] %v229_v1  ;;  %s236_s7 = scalar_lea.sflag [#allocation4], %s721_s25  ;;  %s736_s20 = int_to_ptr.vmem [resolvable:$true] %s252_s20 }
  0x3c   : > { %228 = vst [vmem:[%s219_s19 + $0x8] sm:$0xf] %v225_v2  ;;  %233 = vst [vmem:[%s219_s19] sm:$0xf0] %v231_v3  ;;  %s509_s8 = scalar_lea.vmem %s736_s20, 256  ;;  %s597_s12 = smov [#allocation7]  }
  0x3d   : > { %p510_p8 = scmp.ne.s32.totalorder %s736_s20, %s509_s8  ;;  %s513_s30 = sshll.u32 %s597_s12, 4  ;;  %s514_s30 = int_to_ptr.vmem [resolvable:$false] %s513_s30 }
  0x3e   : > { %s515_s4 = scalar_lea.vmem %s514_s30, 512  ;;  %p516_p13 = scmp.lt.s32.totalorder %s736_s20, %s514_s30 }
  0x3f   : > { %p511_p0 = pnand %p510_p8, %p664_p9  ;;  %p517_p5 = scmp.lt.s32.totalorder %s515_s4, %s509_s8 }
  0x41   : > { %p512_p3 = pneg %p511_p0  ;;  %p518_p12 = por %p517_p5, %p516_p13 }
  0x43   : > { %p519_p6 = pnand %p518_p12, %p512_p3 }
  0x45   : > { %522 = shalt.err (!%p519_p6)
}
  0x46   : > { %s523_s6 = scalar_lea.hbm %s250_s3, 256  ;;  %s527_s27 = scalar_lea.hbm %s783_s2, 512 }
  0x47   : > { %p524_p7 = scmp.ne.s32.totalorder %s250_s3, %s523_s6  ;;  %p528_p4 = scmp.lt.s32.totalorder %s250_s3, %s783_s2 }
  0x48   : > { %p529_p10 = scmp.lt.s32.totalorder %s527_s27, %s523_s6 }
  0x49   : > { %p525_p1 = pnand %p524_p7, %p664_p9 }
  0x4a   : > { %p530_p8 = por %p529_p10, %p528_p4 }
  0x4b   : > { %p526_p2 = pneg %p525_p1 }
  0x4d   : > { %p531_p0 = pnand %p530_p8, %p526_p2 }
  0x4f   : > { %534 = shalt.err (!%p531_p0)
}
  0x50   : > { %388 = dma.vmem_to_hbm [thread:$0]  (%p664_p9), %s736_s20, 256, %s250_s3, %s236_s7  }
  0x51 PF: > { %s264_s16 = sand.u32 1, %s573_s9   ;;  %p790_p3 = scmp.ge.s32.totalorder %s593_s14, 2 }
  0x52   : > { %s265_s18 = scalar_lea.sflag [#allocation4], %s264_s16 }
  0x53   : > { %p398_p13 = pnand %p790_p3, %p671_p11 }
  0x55   : > { %p399_p5 = pneg %p398_p13 }
  0x57   : > { %568 = dma.done.wait (%p399_p5), %s265_s18, 256  }
  0x58   : > { %570 = vsyncadd (%p399_p5), %s265_s18, 4294967040  ;;  %s21_s14 = sadd.s32 1, %s593_s14   ;;  %s791_s9 = smov %s577_s10 }
  0x59   : > { %p18_p12 = scmp.ge.s32.totalorder %s21_s14, 4   ;;  %s792_s10 = smov %s581_s11 }
  0x5a   : > { %s793_s11 = smov %s669_s23  ;;  %s794_s12 = smov %s589_s13 }
  0x5b   : > { %s795_s13 = smov %s797_s17  ;;  %20 = sbr.rel (!%p18_p12) target bundleno = 8 (0x8), region = 86 }
  0x60   :  { %270 = vsyncpa [#allocation3], 1 }
  0x61   :  { %272 = vsyncpa [#allocation3 + $0x1], 1 }
  0x62   :  { %273 = vsyncpa [#allocation6], 1 }
  0x63   :  { %275 = vsyncpa [#allocation6 + $0x1], 1 }
  0x64   :  { %276 = vsyncpa [#allocation4], 1 }
  0x65   :  { %278 = vsyncpa [#allocation4 + $0x1], 1 }

</bundles_post_ra>
